<compile_context>
chip_gen: v7x
topology: tpu7x:2x2x1
jax: 0.10.0
libtpu: 0.0.40
codegen_flags: <defaults>
</compile_context>

<pallas_src>
import jax
import jax.numpy as jnp
from jax.experimental import pallas as pl
from jax.experimental.pallas import tpu as pltpu

_LANES = 128
_BLOCK_ROWS = 2048  # (2048, 128) f32 == 1 MiB per buffer


def _stochastic_sign_kernel(x_ref, p_ref, o_ref):
    x = x_ref[...]
    prob = p_ref[...].astype(x.dtype)
    one = jnp.asarray(1.0, x.dtype)
    two = jnp.asarray(2.0, x.dtype)
    # (1 - x) / 2 <= prob   <=>   x >= 1 - 2 * prob
    cond = x >= one - two * prob
    pos = jnp.asarray(1.0, o_ref.dtype)
    o_ref[...] = jnp.where(cond, pos, -pos)


def _hard_sign_kernel(x_ref, o_ref):
    o_ref[...] = jnp.sign(x_ref[...]).astype(o_ref.dtype)


def _to_slab(x):
    """View x as a lane-dense (M, 128) slab (free reshape when numel % 128 == 0)."""
    n = x.size
    flat = jnp.ravel(x)
    pad = (-n) % _LANES
    if pad:
        # TODO(synk): only hit for ragged numel % 128 != 0 (one extra copy there).
        flat = jnp.pad(flat, (0, pad))
    return flat.reshape(-1, _LANES), n, pad


def _from_slab(slab, n, pad, shape):
    flat = slab.reshape(-1)
    if pad:
        flat = flat[:n]
    return flat.reshape(shape)


def _elementwise_call(kernel, out_dtype, slab, *extra_inputs, block_rows=_BLOCK_ROWS):
    M, L = slab.shape
    tm = min(block_rows, M)
    if tm != M:
        tm = max(8, (tm // 8) * 8)  # sublane-aligned block rows
    grid = (pl.cdiv(M, tm),)
    spec = pl.BlockSpec((tm, L), lambda i: (i, 0))
    n_in = 1 + len(extra_inputs)
    return pl.pallas_call(
        kernel,
        out_shape=jax.ShapeDtypeStruct((M, L), out_dtype),
        grid=grid,
        in_specs=[spec] * n_in,
        out_specs=spec,
        compiler_params=pltpu.CompilerParams(
            dimension_semantics=("parallel",),
        ),
    )(slab, *extra_inputs)


def differentiable_sign(x, *, training=True, key=None):
    slab, n, pad = _to_slab(x)
    if training:
        if key is None:
            key = jax.random.PRNGKey(0)
        prob = jax.random.uniform(key, x.shape, dtype=jnp.float32)
        prob_slab, _, _ = _to_slab(prob)
        out_slab = _elementwise_call(_stochastic_sign_kernel, x.dtype, slab, prob_slab)
    else:
        out_slab = _elementwise_call(_hard_sign_kernel, x.dtype, slab)
    return _from_slab(out_slab, n, pad, x.shape)


if __name__ == "__main__":
    root = jax.random.PRNGKey(0)
    kx, kp = jax.random.split(root)
    # NCHW activation tensor.
    x = jax.random.uniform(kx, (2, 4, 16, 16), jnp.float32, minval=-1.0, maxval=1.0)

    # Training mode (stochastic binarization).
    y_train = jax.block_until_ready(differentiable_sign(x, training=True, key=kp))
    assert y_train.shape == x.shape and y_train.dtype == x.dtype
    assert bool(jnp.all(jnp.abs(y_train) == 1.0))
    # Check against the exact same uniforms the wrapper drew.
    prob = jax.random.uniform(kp, x.shape, dtype=jnp.float32)
    expected = jnp.where(x >= 1.0 - 2.0 * prob, jnp.float32(1.0), jnp.float32(-1.0))
    assert bool(jnp.all(y_train == expected))

    # Eval mode (hard sign).
    y_eval = jax.block_until_ready(differentiable_sign(x, training=False))
    assert y_eval.shape == x.shape and y_eval.dtype == x.dtype
    assert bool(jnp.all(y_eval == jnp.sign(x)))

    print("KERNEL_OK")
</pallas_src>

<mosaic_0001>
module attributes {stable_mosaic.version = 11 : i64} {
  func.func @_stochastic_sign_kernel(%arg0: i32, %arg1: memref<16x128xf32, #tpu.memory_space<vmem>>, %arg2: memref<16x128xf32, #tpu.memory_space<vmem>>, %arg3: memref<16x128xf32, #tpu.memory_space<vmem>>) attributes {dimension_semantics = [#tpu.dimension_semantics<parallel>], iteration_bounds = array<i64: 1>, scalar_prefetch = 0 : i64, scratch_operands = 0 : i64, tpu.core_type = #tpu.core_type<tc>, window_params = [{transform_indices = @transform_0, window_bounds = array<i64: 16, 128>}, {transform_indices = @transform_1, window_bounds = array<i64: 16, 128>}, {transform_indices = @transform_2, window_bounds = array<i64: 16, 128>}]} {
    %c0 = arith.constant 0 : index
    %c0_0 = arith.constant 0 : index
    %0 = vector.load %arg1[%c0, %c0_0] : memref<16x128xf32, #tpu.memory_space<vmem>>, vector<16x128xf32>
    %c0_1 = arith.constant 0 : index
    %c0_2 = arith.constant 0 : index
    %1 = vector.load %arg2[%c0_1, %c0_2] : memref<16x128xf32, #tpu.memory_space<vmem>>, vector<16x128xf32>
    %cst = arith.constant 2.000000e+00 : f32
    %2 = vector.broadcast %cst : f32 to vector<16x128xf32>
    %3 = arith.mulf %2, %1 : vector<16x128xf32>
    %cst_3 = arith.constant 1.000000e+00 : f32
    %4 = vector.broadcast %cst_3 : f32 to vector<16x128xf32>
    %5 = arith.subf %4, %3 : vector<16x128xf32>
    %6 = arith.cmpf oge, %0, %5 : vector<16x128xf32>
    %cst_4 = arith.constant 0.000000e+00 : f32
    %cst_5 = arith.constant 1.000000e+00 : f32
    %7 = arith.subf %cst_4, %cst_5 : f32
    %cst_6 = arith.constant 1.000000e+00 : f32
    %8 = vector.broadcast %cst_6 : f32 to vector<16x128xf32>
    %9 = vector.broadcast %7 : f32 to vector<16x128xf32>
    %10 = arith.select %6, %8, %9 : vector<16x128xi1>, vector<16x128xf32>
    %c0_7 = arith.constant 0 : index
    %c0_8 = arith.constant 0 : index
    %11 = vector.load %arg3[%c0_7, %c0_8] : memref<16x128xf32, #tpu.memory_space<vmem>>, vector<16x128xf32>
    tpu.vector_store %arg3[%c0_7, %c0_8], %10 {strides = array<i32>} : memref<16x128xf32, #tpu.memory_space<vmem>>, vector<16x128xf32>,
    return
  }
  func.func @transform_0(%arg0: i32) -> (i32, i32) {
    %c0_i32 = arith.constant 0 : i32
    %c0_i32_0 = arith.constant 0 : i32
    return %arg0, %c0_i32 : i32, i32
  }
  func.func @transform_1(%arg0: i32) -> (i32, i32) {
    %c0_i32 = arith.constant 0 : i32
    %c0_i32_0 = arith.constant 0 : i32
    return %arg0, %c0_i32 : i32, i32
  }
  func.func @transform_2(%arg0: i32) -> (i32, i32) {
    %c0_i32 = arith.constant 0 : i32
    %c0_i32_0 = arith.constant 0 : i32
    return %arg0, %c0_i32 : i32, i32
  }
}

</mosaic_0001>

<bundles_post_ra>
// kernel: tpu_custom_call.1
= control target key start
LH: loop header
LB: loop body
LE: loop exit
PB: predicated region body
PF: predicated region fallthrough
CT: control target
= control target key end

     0   :  { %7 = vsyncpa [#allocation3], 0  ;;  %s216_s0 = inlined_call_operand.hbm [shape: f32[16,128], index: 0, kind: input, shape index: {}]   ;;  %s217_s1 = inlined_call_operand.hbm [shape: f32[16,128], index: 1, kind: input, shape index: {}]   ;;  %s218_s2 = inlined_call_operand.hbm [shape: f32[16,128], index: 2, kind: output, shape index: {}]  }
   0x1   :  { %8 = vsyncpa [#allocation6], 0 }
   0x2   :  { %9 = vsyncpa [#allocation4], 0  ;;  %s150_s9 = smov [#allocation2]   ;;  %s78_s13 = scalar_lea.hbm %s216_s0, 256 }
   0x3   :  { %s15_s10 = sshll.u32 %s150_s9, 4  ;;  %p79_p0 = scmp.ne.s32.totalorder %s216_s0, %s78_s13  ;;  %s16_s10 = int_to_ptr.vmem [resolvable:$true] %s15_s10 }
   0x4   :  { %p82_p1 = scmp.lt.u32.totalorder %s78_s13, %s216_s0 }
   0x6   :  { %p84_p2 = pnand %p82_p1, %p79_p0 }
   0x8   :  { %87 = shalt.err (!%p84_p2)
}
   0x9   :  { %s88_s18 = scalar_lea.vmem %s16_s10, 256  ;;  %p93_p4 = scmp.lt.s32.totalorder %s16_s10, %s16_s10 }
   0xa   :  { %p89_p3 = scmp.ne.s32.totalorder %s16_s10, %s88_s18  ;;  %p94_p5 = scmp.lt.s32.totalorder %s88_s18, %s88_s18 }
   0xc   :  { %p95_p6 = por %p94_p5, %p93_p4 }
   0xe   :  { %p96_p7 = pnand %p95_p6, %p89_p3 }
  0x10   :  { %99 = shalt.err (!%p96_p7)
}
  0x11   :  { %s151_s19 = smov 128   ;;  %s152_s20 = smov 8  }
  0x12   :  { %21 = dma.hbm_to_vmem [thread:$0]  %s216_s0, 256, %s16_s10, [#allocation3], %s151_s19, %s151_s19, %s152_s20  }
  0x13   :  { %s153_s23 = smov [#allocation5]   ;;  %s100_s27 = scalar_lea.hbm %s217_s1, 256 }
  0x14   :  { %s27_s24 = sshll.u32 %s153_s23, 4  ;;  %p101_p8 = scmp.ne.s32.totalorder %s217_s1, %s100_s27  ;;  %s28_s24 = int_to_ptr.vmem [resolvable:$true] %s27_s24 }
  0x15   :  { %p104_p9 = scmp.lt.u32.totalorder %s100_s27, %s217_s1 }
  0x17   :  { %p106_p10 = pnand %p104_p9, %p101_p8 }
  0x19   :  { %109 = shalt.err (!%p106_p10)
}
  0x1a   :  { %s110_s4 = scalar_lea.vmem %s28_s24, 256  ;;  %p115_p12 = scmp.lt.s32.totalorder %s28_s24, %s28_s24 }
  0x1b   :  { %p111_p11 = scmp.ne.s32.totalorder %s28_s24, %s110_s4  ;;  %p116_p13 = scmp.lt.s32.totalorder %s110_s4, %s110_s4 }
  0x1d   :  { %p117_p0 = por %p116_p13, %p115_p12 }
  0x1f   :  { %p118_p1 = pnand %p117_p0, %p111_p11 }
  0x21   :  { %121 = shalt.err (!%p118_p1)
}
  0x22   :  { %33 = dma.hbm_to_vmem [thread:$0]  %s217_s1, 256, %s28_s24, [#allocation6], %s151_s19, %s151_s19, %s152_s20  }
  0x23   :  { %144 = dma.done.wait [#allocation3], 256  }
  0x24   :  { %145 = vsyncadd [#allocation3], 4294967040 }
  0x25   :  { %146 = dma.done.wait [#allocation6], 256  }
  0x26   :  { %147 = vsyncadd [#allocation6], 4294967040  ;;  %v42_v0 = vld [vmem:[#allocation5] sm:$0xff]  ;;  %v43_v2 = vld [vmem:[#allocation5 + $0x8] sm:$0xff]  ;;  %s154_s6 = smov [#allocation7]   ;;  %v155_v8 = vmov -1.0  }
  0x27   :  { %v44_v1 = vmul.f32 2.0, %v42_v0  ;;  %v40_v3 = vld [vmem:[#allocation2] sm:$0xff]  ;;  %v45_v4 = vmul.f32 2.0, %v43_v2  ;;  %v41_v6 = vld [vmem:[#allocation2 + $0x8] sm:$0xff]  ;;  %s59_s7 = sshll.u32 %s154_s6, 4  ;;  %s60_s7 = int_to_ptr.vmem [resolvable:$true] %s59_s7 }
  0x28   :  { %s122_s1 = scalar_lea.vmem %s60_s7, 256  ;;  %p127_p3 = scmp.lt.s32.totalorder %s60_s7, %s60_s7 }
  0x29   :  { %v46_v5 = vsub.f32 1.0, %v44_v1  ;;  %v47_v7 = vsub.f32 1.0, %v45_v4  ;;  %p123_p2 = scmp.ne.s32.totalorder %s60_s7, %s122_s1  ;;  %p128_p4 = scmp.lt.s32.totalorder %s122_s1, %s122_s1 }
  0x2b   :  { %vm48_vm0 = vcmp.ge.f32.partialorder %v40_v3, %v46_v5  ;;  %vm49_vm1 = vcmp.ge.f32.partialorder %v41_v6, %v47_v7  ;;  %p129_p5 = por %p128_p4, %p127_p3 }
  0x2c   :  { %v50_v9 = vsel %vm48_vm0, 1.0, %v155_v8  ;;  %v51_v10 = vsel %vm49_vm1, 1.0, %v155_v8 }
  0x2d   :  { %52 = vst [vmem:[#allocation7] sm:$0xff] %v50_v9  ;;  %53 = vst [vmem:[#allocation7 + $0x8] sm:$0xff] %v51_v10  ;;  %p130_p6 = pnand %p129_p5, %p123_p2 }
  0x2f   :  { %133 = shalt.err (!%p130_p6)
}
  0x30   :  { %s134_s10 = scalar_lea.hbm %s218_s2, 256 }
  0x31   :  { %p135_p7 = scmp.ne.s32.totalorder %s218_s2, %s134_s10  ;;  %p138_p8 = scmp.lt.u32.totalorder %s134_s10, %s218_s2 }
  0x33   :  { %p140_p9 = pnand %p138_p8, %p135_p7 }
  0x35   :  { %143 = shalt.err (!%p140_p9)
}
  0x36   :  { %65 = dma.vmem_to_hbm [thread:$0]  %s60_s7, 256, %s218_s2, [#allocation4], %s151_s19, %s151_s19, %s152_s20  }
  0x37   :  { %148 = dma.done.wait [#allocation4], 256  }
  0x38   :  { %149 = vsyncadd [#allocation4], 4294967040 }
  0x39   :  { %69 = vsyncpa [#allocation3], 1 }
  0x3a   :  { %70 = vsyncpa [#allocation6], 1 }
  0x3b   :  { %71 = vsyncpa [#allocation4], 1 }

</bundles_post_ra>
